<compile_context>
chip_gen: v6e
topology: v6e:2x2x1
jax: 0.10.0
libtpu: 0.0.40
codegen_flags: <defaults>
</compile_context>

<pallas_src>
import functools

import jax
import jax.numpy as jnp
from jax.experimental import pallas as pl
from jax.experimental.pallas import tpu as pltpu

_LANE = 128


def _swish_kernel(x_ref, o_ref, *, compute_dtype):
    x = x_ref[...].astype(compute_dtype)
    # Numerically stable sigmoid: 0.5 * (tanh(x/2) + 1)  (EUP slot).
    sig = (jnp.tanh(x * 0.5) + 1.0) * 0.5
    o_ref[...] = (x * sig).astype(o_ref.dtype)


def _swish_jnp(x):
    """Plain-JAX swish for tiny tails (< 128 elements), same stable form."""
    xf = x.astype(jnp.float32)
    return (xf * (0.5 * (jnp.tanh(xf * 0.5) + 1.0))).astype(x.dtype)


def _chip_traits():
    """(multi_tensorcore, bf16_vector_units, per_buffer_byte_budget)."""
    try:
        kind = jax.devices()[0].device_kind.lower()
    except Exception:  # pragma: no cover - defensive (e.g. interpret mode)
        kind = ""
    multi_tc = "v7" in kind                       # v7x: 2 TensorCores/chip
    old_chip = any(t in kind for t in ("v2", "v3", "v4", "v5"))
    bf16_units = not old_chip                     # v6e/v7x VPU+EUP are bf16-capable
    budget = 2 * 1024 * 1024 if "v5" in kind else 4 * 1024 * 1024
    return multi_tc, bf16_units, budget


def _swish_aligned(flat):
    """Pallas path. `flat` is 1-D with size a multiple of 128."""
    dtype = flat.dtype
    n_work = flat.size
    itemsize = jnp.dtype(dtype).itemsize
    sublane_align = max(8, 32 // itemsize)        # 8 (f32), 16 (bf16), 32 (8-bit)

    multi_tc, bf16_units, budget = _chip_traits()
    compute_dtype = dtype if (dtype == jnp.bfloat16 and bf16_units) else jnp.float32

    # Widest lane-dense slab width that exactly divides the element count.
    C = _LANE
    for cand in (1024, 512, 256):
        if n_work % cand == 0:
            C = cand
            break
    rows = n_work // C
    x2 = flat.reshape(rows, C)

    # Rows per block from the per-chip byte budget, sublane-aligned.
    tr_budget = max(
        sublane_align,
        (budget // (C * itemsize)) // sublane_align * sublane_align,
    )
    tr = min(rows, tr_budget)

    if multi_tc:
        # v7x only: make sure both TensorCores get work, and keep small grids
        # even so the 2 TCs are balanced.
        if pl.cdiv(rows, tr) == 1 and rows >= 2 * sublane_align:
            half = (rows + 1) // 2
            tr = ((half + sublane_align - 1) // sublane_align) * sublane_align
        num_blocks = pl.cdiv(rows, tr)
        if 1 < num_blocks <= 8 and num_blocks % 2 == 1:
            t = tr - sublane_align
            while t >= sublane_align:
                if pl.cdiv(rows, t) % 2 == 0:
                    tr = t
                    break
                t -= sublane_align

    grid = (pl.cdiv(rows, tr),)  # partial boundary block handled by Pallas

    out = pl.pallas_call(
        functools.partial(_swish_kernel, compute_dtype=compute_dtype),
        out_shape=jax.ShapeDtypeStruct((rows, C), dtype),
        grid_spec=pltpu.PrefetchScalarGridSpec(
            num_scalar_prefetch=0,
            grid=grid,
            in_specs=[pl.BlockSpec((tr, C), lambda i: (i, 0))],
            out_specs=pl.BlockSpec((tr, C), lambda i: (i, 0)),
        ),
        compiler_params=pltpu.CompilerParams(
            dimension_semantics=("parallel",),
        ),
        cost_estimate=pl.CostEstimate(
            flops=3 * n_work,
            transcendentals=n_work,
            bytes_accessed=2 * n_work * itemsize,
        ),
    )(x2)
    return out.reshape(-1)


def swish(x):
    """Applies x * sigmoid(x) elementwise. Floating-point inputs only."""
    orig_shape = x.shape
    if not jnp.issubdtype(x.dtype, jnp.floating):
        raise TypeError(f"swish expects a floating-point input, got {x.dtype}")
    n = x.size
    if n == 0:
        return x

    flat = x.reshape(-1)
    n_aligned = (n // _LANE) * _LANE

    if n_aligned == 0:
        # Tiny tensor (< 128 elements): plain JAX, no kernel launch needed.
        return _swish_jnp(flat).reshape(orig_shape)

    if n_aligned == n:
        out_flat = _swish_aligned(flat)
    else:
        # 128-aligned prefix through the kernel; <128-element tail in plain JAX.
        head = _swish_aligned(flat[:n_aligned])
        tail = _swish_jnp(flat[n_aligned:])
        out_flat = jnp.concatenate([head, tail])

    return out_flat.reshape(orig_shape)


def _ref_swish(x):
    xf = x.astype(jnp.float32)
    return (xf * jax.nn.sigmoid(xf)).astype(x.dtype)


if __name__ == "__main__":
    key = jax.random.PRNGKey(0)
    k0, k1, k2, k3, k4 = jax.random.split(key, 5)

    # Primary demo input (NCHW-style): (batch=2, C=4, H=16, W=16) -> 2048 elems,
    # re-slabbed copy-free to a (2, 1024) lane-dense block.
    x = jax.random.normal(k0, (2, 4, 16, 16), dtype=jnp.float32)
    y = swish(x)
    jax.block_until_ready(y)
    assert y.shape == x.shape and y.dtype == x.dtype
    assert jnp.allclose(y, _ref_swish(x), atol=1e-5, rtol=1e-5), "mismatch (aligned)"

    # Tiny unaligned tensor (105 elems < 128): pure plain-JAX tail path.
    xu = jax.random.normal(k1, (3, 7, 5), dtype=jnp.float32)
    yu = swish(xu)
    jax.block_until_ready(yu)
    assert yu.shape == xu.shape and yu.dtype == xu.dtype
    assert jnp.allclose(yu, _ref_swish(xu), atol=1e-5, rtol=1e-5), "mismatch (tiny)"

    # Unaligned count > 128 (150 elems): kernel prefix + plain-JAX tail.
    xp = jax.random.normal(k2, (3, 50), dtype=jnp.float32)
    yp = swish(xp)
    jax.block_until_ready(yp)
    assert yp.shape == xp.shape and yp.dtype == xp.dtype
    assert jnp.allclose(yp, _ref_swish(xp), atol=1e-5, rtol=1e-5), "mismatch (prefix+tail)"

    # Larger aligned tensor (multi-row slab path).
    xm = jax.random.normal(k3, (4, 8, 512), dtype=jnp.float32)
    ym = swish(xm)
    jax.block_until_ready(ym)
    assert ym.shape == xm.shape and ym.dtype == xm.dtype
    assert jnp.allclose(ym, _ref_swish(xm), atol=1e-5, rtol=1e-5), "mismatch (multi-row)"

    # bf16 path (native bf16 math on v6e/v7x, f32 upcast on older chips).
    xb = jax.random.normal(k4, (2, 4, 16, 16), dtype=jnp.bfloat16)
    yb = swish(xb)
    jax.block_until_ready(yb)
    assert yb.shape == xb.shape and yb.dtype == xb.dtype
    assert jnp.allclose(yb.astype(jnp.float32), _ref_swish(xb).astype(jnp.float32),
                        atol=5e-2, rtol=5e-2), "mismatch (bf16)"

    print("KERNEL_OK")
</pallas_src>

<mosaic_0001>
module attributes {stable_mosaic.version = 11 : i64} {
  func.func @_swish_kernel(%arg0: i32, %arg1: memref<2x1024xf32, #tpu.memory_space<vmem>>, %arg2: memref<2x1024xf32, #tpu.memory_space<vmem>>) attributes {dimension_semantics = [#tpu.dimension_semantics<parallel>], iteration_bounds = array<i64: 1>, scalar_prefetch = 0 : i64, scratch_operands = 0 : i64, tpu.core_type = #tpu.core_type<tc>, window_params = [{transform_indices = @transform_0, window_bounds = array<i64: 2, 1024>}, {transform_indices = @transform_1, window_bounds = array<i64: 2, 1024>}]} {
    %c0 = arith.constant 0 : index
    %c0_0 = arith.constant 0 : index
    %0 = vector.load %arg1[%c0, %c0_0] : memref<2x1024xf32, #tpu.memory_space<vmem>>, vector<2x1024xf32>
    %cst = arith.constant 5.000000e-01 : f32
    %1 = vector.broadcast %cst : f32 to vector<2x1024xf32>
    %2 = arith.mulf %0, %1 : vector<2x1024xf32>
    %3 = math.tanh %2 : vector<2x1024xf32>
    %cst_1 = arith.constant 1.000000e+00 : f32
    %4 = vector.broadcast %cst_1 : f32 to vector<2x1024xf32>
    %5 = arith.addf %3, %4 : vector<2x1024xf32>
    %cst_2 = arith.constant 5.000000e-01 : f32
    %6 = vector.broadcast %cst_2 : f32 to vector<2x1024xf32>
    %7 = arith.mulf %5, %6 : vector<2x1024xf32>
    %8 = arith.mulf %0, %7 : vector<2x1024xf32>
    %c0_3 = arith.constant 0 : index
    %c0_4 = arith.constant 0 : index
    %9 = vector.load %arg2[%c0_3, %c0_4] : memref<2x1024xf32, #tpu.memory_space<vmem>>, vector<2x1024xf32>
    tpu.vector_store %arg2[%c0_3, %c0_4], %8 {strides = array<i32>} : memref<2x1024xf32, #tpu.memory_space<vmem>>, vector<2x1024xf32>,
    return
  }
  func.func @transform_0(%arg0: i32) -> (i32, i32) {
    %c0_i32 = arith.constant 0 : i32
    %c0_i32_0 = arith.constant 0 : i32
    return %arg0, %c0_i32 : i32, i32
  }
  func.func @transform_1(%arg0: i32) -> (i32, i32) {
    %c0_i32 = arith.constant 0 : i32
    %c0_i32_0 = arith.constant 0 : i32
    return %arg0, %c0_i32 : i32, i32
  }
}

</mosaic_0001>

<bundles_post_ra>
// kernel: tpu_custom_call.1
= control target key start
LH: loop header
LB: loop body
LE: loop exit
PB: predicated region body
PF: predicated region fallthrough
CT: control target
= control target key end

     0   :  { %6 = vsyncpa [#allocation3], 0  ;;  %s118_s0 = inlined_call_operand.hbm [shape: f32[2,1024], index: 0, kind: input, shape index: {}]   ;;  %s119_s1 = inlined_call_operand.hbm [shape: f32[2,1024], index: 1, kind: output, shape index: {}]  }
   0x1   :  { %7 = vsyncpa [#allocation4], 0  ;;  %s100_s6 = smov [#allocation2]  }
   0x2   :  { %s14_s7 = sshll.u32 %s100_s6, 4  ;;  %s15_s7 = int_to_ptr.vmem [resolvable:$true] %s14_s7 }
   0x3   :  { %s64_s8 = scalar_lea.vmem %s15_s7, 256  ;;  %p69_p1 = scmp.lt.s32.totalorder %s15_s7, %s15_s7 }
   0x4   :  { %p65_p0 = scmp.ne.s32.totalorder %s15_s7, %s64_s8  ;;  %p70_p2 = scmp.lt.s32.totalorder %s64_s8, %s64_s8 }
   0x6   :  { %p71_p3 = por %p70_p2, %p69_p1 }
   0x8   :  { %p72_p4 = pnand %p71_p3, %p65_p0 }
   0xa   :  { %75 = shalt.err (!%p72_p4)
}
   0xb   :  { %17 = dma.hbm_to_vmem [thread:$0]  %s118_s0, 256, %s15_s7, [#allocation3]  }
   0xc   :  { %96 = dma.done.wait [#allocation3], 256  }
   0xd   :  { %97 = vsyncadd [#allocation3], 4294967040  ;;  %v21_v0 = vld [vmem:[#allocation2] sm:$0xff]  ;;  %v22_v1 = vld [vmem:[#allocation2 + $0x8] sm:$0xff]  ;;  %s101_s11 = smov [#allocation5]  }
   0xe   :  { %v23_v2 = vmul.f32 0.5, %v21_v0  ;;  %v24_v3 = vmul.f32 0.5, %v22_v1  ;;  %s41_s12 = sshll.u32 %s101_s11, 4  ;;  %s42_s12 = int_to_ptr.vmem [resolvable:$true] %s41_s12 }
   0xf   :  { %s76_s0 = scalar_lea.vmem %s42_s12, 256  ;;  %p81_p6 = scmp.lt.s32.totalorder %s42_s12, %s42_s12 }
  0x10   :  { %52 = vtanh.f32 %v23_v2  ;;  %p77_p5 = scmp.ne.s32.totalorder %s42_s12, %s76_s0  ;;  %p82_p7 = scmp.lt.s32.totalorder %s76_s0, %s76_s0 }
  0x11   :  { %54 = vtanh.f32 %v24_v3 }
  0x12   :  { %p83_p8 = por %p82_p7, %p81_p6 }
  0x14   :  { %p84_p9 = pnand %p83_p8, %p77_p5 }
  0x1d   :  { %v53_v4 = vpop.eup %52 }
  0x1e   :  { %v55_v5 = vpop.eup %54  ;;  %v27_v6 = vadd.f32 1.0, %v53_v4 }
  0x1f   :  { %v28_v7 = vadd.f32 1.0, %v55_v5 }
  0x20   :  { %v29_v8 = vmul.f32 0.5, %v27_v6 }
  0x21   :  { %v30_v9 = vmul.f32 0.5, %v28_v7 }
  0x22   :  { %v31_v10 = vmul.f32 %v29_v8, %v21_v0 }
  0x23   :  { %v32_v11 = vmul.f32 %v30_v9, %v22_v1 }
  0x24   :  { %33 = vst [vmem:[#allocation5] sm:$0xff] %v31_v10 }
  0x25   :  { %34 = vst [vmem:[#allocation5 + $0x8] sm:$0xff] %v32_v11 }
  0x26   :  { %87 = shalt.err (!%p84_p9)
}
  0x27   :  { %44 = dma.vmem_to_hbm [thread:$0]  %s42_s12, 256, %s119_s1, [#allocation4]  }
  0x28   :  { %98 = dma.done.wait [#allocation4], 256  }
  0x29   :  { %99 = vsyncadd [#allocation4], 4294967040 }
  0x2a   :  { %48 = vsyncpa [#allocation3], 1 }
  0x2b   :  { %49 = vsyncpa [#allocation4], 1 }

</bundles_post_ra>
